<compile_context>
chip_gen: v6e
topology: v6e:2x2x1
jax: 0.10.0
libtpu: 0.0.40
codegen_flags: <defaults>
</compile_context>

<pallas_src>
import functools

import jax
import jax.numpy as jnp
from jax.experimental import pallas as pl
from jax.experimental.pallas import tpu as pltpu

SUBLANE = 8  # f32 sublane count


def _round_up(x, m):
    return (x + m - 1) // m * m


def dqn_kernel(x_ref,
               w1_ref, b1_ref,
               w2_ref, b2_ref,
               w3_ref, b3_ref,
               w4_ref, b4_ref,
               o_ref):
    """One batch tile: 4 MXU matmuls + VPU ReLUs, f32 accumulation throughout."""
    cdt = w1_ref.dtype                      # MXU compute dtype (f32 or bf16)
    x = x_ref[...].astype(cdt)

    h = jnp.dot(x, w1_ref[...], preferred_element_type=jnp.float32) + b1_ref[...]
    h = jnp.maximum(h, 0.0)                                     # relu(fc1)

    h = jnp.dot(h.astype(cdt), w2_ref[...],
                preferred_element_type=jnp.float32) + b2_ref[...]
    h = jnp.maximum(h, 0.0)                                     # relu(fc2)

    h = jnp.dot(h.astype(cdt), w3_ref[...],
                preferred_element_type=jnp.float32) + b3_ref[...]
    h = jnp.maximum(h, 0.0)                                     # relu(fc2_1)

    out = jnp.dot(h.astype(cdt), w4_ref[...],
                  preferred_element_type=jnp.float32) + b4_ref[...]
    o_ref[...] = out.astype(o_ref.dtype)                        # fc3


@functools.partial(jax.jit, static_argnames=("block_b", "compute_dtype"))
def dqn_forward(x, params, *, block_b=1024, compute_dtype=jnp.float32):
    """x: (B, input_dim) float32.  params: dict of weights (in,out) / biases (1,out)."""
    B, in_dim = x.shape
    out_dim = params["w4"].shape[1]

    # Batch tile: big enough to amortize per-grid-step overhead, capped so that
    # large batches produce >= 2 grid steps (both v7x TensorCores engage).
    if B <= SUBLANE:
        tb = B                                        # one full-extent block
    else:
        tb = _round_up(min(block_b, B), SUBLANE)
        if B >= 2 * SUBLANE:
            tb = min(tb, _round_up(pl.cdiv(B, 2), SUBLANE))
    grid = (pl.cdiv(B, tb),)                          # last block may be partial

    # Weights in compute dtype (tiny, DMA'd once); biases stay f32 (added after
    # the f32 MXU accumulation).  x stays f32 in HBM and is cast in-kernel.
    w1 = params["w1"].astype(compute_dtype)
    w2 = params["w2"].astype(compute_dtype)
    w3 = params["w3"].astype(compute_dtype)
    w4 = params["w4"].astype(compute_dtype)
    b1 = params["b1"].astype(jnp.float32)
    b2 = params["b2"].astype(jnp.float32)
    b3 = params["b3"].astype(jnp.float32)
    b4 = params["b4"].astype(jnp.float32)

    def resident(arr):
        # Whole array as one block, constant index_map: fetched once, VMEM-resident.
        return pl.BlockSpec(arr.shape, lambda i, nd=arr.ndim: (0,) * nd)

    h1, h2, h3 = w1.shape[1], w2.shape[1], w3.shape[1]
    flops = 2 * B * (in_dim * h1 + h1 * h2 + h2 * h3 + h3 * out_dim)
    bytes_accessed = (
        x.size * x.dtype.itemsize
        + sum(a.size * a.dtype.itemsize for a in (w1, b1, w2, b2, w3, b3, w4, b4))
        + B * out_dim * 4)

    return pl.pallas_call(
        dqn_kernel,
        out_shape=jax.ShapeDtypeStruct((B, out_dim), jnp.float32),
        grid=grid,
        in_specs=[
            pl.BlockSpec((tb, in_dim), lambda i: (i, 0)),   # x: pipelined per tile
            resident(w1), resident(b1),
            resident(w2), resident(b2),
            resident(w3), resident(b3),
            resident(w4), resident(b4),
        ],
        out_specs=pl.BlockSpec((tb, out_dim), lambda i: (i, 0)),
        compiler_params=pltpu.CompilerParams(
            dimension_semantics=("parallel",)),             # 2 TCs on v7x
        cost_estimate=pl.CostEstimate(
            flops=flops, transcendentals=0, bytes_accessed=bytes_accessed),
    )(x, w1, b1, w2, b2, w3, b3, w4, b4)


def init_dqn_params(key, input_dim, output_dim):
    """Deterministic init mirroring the layer shapes of the PyTorch DQN."""
    dims = [input_dim, 4 * output_dim, 2 * output_dim, output_dim, output_dim]
    params = {}
    for i in range(4):
        key, wk, bk = jax.random.split(key, 3)
        bound = 1.0 / jnp.sqrt(dims[i])     # torch.nn.Linear default scheme
        params[f"w{i+1}"] = jax.random.uniform(
            wk, (dims[i], dims[i + 1]), jnp.float32, -bound, bound)
        params[f"b{i+1}"] = jax.random.uniform(
            bk, (1, dims[i + 1]), jnp.float32, -bound, bound)
    return params


def dqn_reference(x, params, compute_dtype=jnp.float32):
    """Pure-JAX reference matching the kernel's dtype handling."""
    def dot(a, w):
        return jnp.dot(a.astype(compute_dtype), w.astype(compute_dtype),
                       preferred_element_type=jnp.float32)
    h = jnp.maximum(dot(x, params["w1"]) + params["b1"], 0.0)
    h = jnp.maximum(dot(h, params["w2"]) + params["b2"], 0.0)
    h = jnp.maximum(dot(h, params["w3"]) + params["b3"], 0.0)
    return dot(h, params["w4"]) + params["b4"]


if __name__ == "__main__":
    key = jax.random.PRNGKey(0)
    key, xk, pk, x2k = jax.random.split(key, 4)

    input_dim, output_dim = 16, 8
    params = init_dqn_params(pk, input_dim, output_dim)

    # Tolerance note: f32 checks are loose enough to absorb MXU default-precision
    # (multi-pass bf16) differences between the Pallas kernel and XLA's reference
    # matmuls; real semantic bugs (wrong transpose / missing bias / relu) would
    # produce O(0.1-1) errors and still fail.
    TOL = 2e-2

    # --- tiny RL-style batch: f32, single (partial) block, no pad/cast/slice ---
    x_small = jax.random.normal(xk, (4, input_dim), jnp.float32)
    out_small = jax.block_until_ready(dqn_forward(x_small, params))
    ref_small = dqn_reference(x_small, params)
    assert out_small.shape == (4, output_dim)
    assert jnp.allclose(out_small, ref_small, atol=TOL, rtol=TOL)

    # --- larger batch: f32, 2 pipelined batch tiles (partial last block) -------
    x_big = jax.random.normal(x2k, (500, input_dim), jnp.float32)
    out_big = jax.block_until_ready(dqn_forward(x_big, params))
    ref_big = dqn_reference(x_big, params)
    assert out_big.shape == (500, output_dim)
    assert jnp.allclose(out_big, ref_big, atol=TOL, rtol=TOL)

    # --- optional bf16-weight compute path (x stays f32 in HBM, cast in-kernel) -
    out_bf16 = jax.block_until_ready(
        dqn_forward(x_big, params, compute_dtype=jnp.bfloat16))
    ref_bf16 = dqn_reference(x_big, params, compute_dtype=jnp.bfloat16)
    assert out_bf16.shape == (500, output_dim)
    assert jnp.allclose(out_bf16, ref_bf16, atol=TOL, rtol=TOL)

    print("KERNEL_OK")
</pallas_src>

<mosaic_0001>
module attributes {stable_mosaic.version = 11 : i64} {
  func.func @dqn_kernel(%arg0: i32, %arg1: memref<4x16xf32, #tpu.memory_space<vmem>>, %arg2: memref<16x32xf32, #tpu.memory_space<vmem>>, %arg3: memref<1x32xf32, #tpu.memory_space<vmem>>, %arg4: memref<32x16xf32, #tpu.memory_space<vmem>>, %arg5: memref<1x16xf32, #tpu.memory_space<vmem>>, %arg6: memref<16x8xf32, #tpu.memory_space<vmem>>, %arg7: memref<1x8xf32, #tpu.memory_space<vmem>>, %arg8: memref<8x8xf32, #tpu.memory_space<vmem>>, %arg9: memref<1x8xf32, #tpu.memory_space<vmem>>, %arg10: memref<4x8xf32, #tpu.memory_space<vmem>>) attributes {dimension_semantics = [#tpu.dimension_semantics<parallel>], iteration_bounds = array<i64: 1>, scalar_prefetch = 0 : i64, scratch_operands = 0 : i64, tpu.core_type = #tpu.core_type<tc>, window_params = [{transform_indices = @transform_0, window_bounds = array<i64: 4, 16>}, {pipeline_mode = #tpu.pipeline_mode<synchronous>, transform_indices = @transform_1, window_bounds = array<i64: 16, 32>}, {pipeline_mode = #tpu.pipeline_mode<synchronous>, transform_indices = @transform_2, window_bounds = array<i64: 1, 32>}, {pipeline_mode = #tpu.pipeline_mode<synchronous>, transform_indices = @transform_3, window_bounds = array<i64: 32, 16>}, {pipeline_mode = #tpu.pipeline_mode<synchronous>, transform_indices = @transform_4, window_bounds = array<i64: 1, 16>}, {pipeline_mode = #tpu.pipeline_mode<synchronous>, transform_indices = @transform_5, window_bounds = array<i64: 16, 8>}, {pipeline_mode = #tpu.pipeline_mode<synchronous>, transform_indices = @transform_6, window_bounds = array<i64: 1, 8>}, {pipeline_mode = #tpu.pipeline_mode<synchronous>, transform_indices = @transform_7, window_bounds = array<i64: 8, 8>}, {pipeline_mode = #tpu.pipeline_mode<synchronous>, transform_indices = @transform_8, window_bounds = array<i64: 1, 8>}, {transform_indices = @transform_9, window_bounds = array<i64: 4, 8>}]} {
    %c0 = arith.constant 0 : index
    %c0_0 = arith.constant 0 : index
    %0 = vector.load %arg1[%c0, %c0_0] : memref<4x16xf32, #tpu.memory_space<vmem>>, vector<4x16xf32>
    %c0_1 = arith.constant 0 : index
    %c0_2 = arith.constant 0 : index
    %1 = vector.load %arg2[%c0_1, %c0_2] : memref<16x32xf32, #tpu.memory_space<vmem>>, vector<16x32xf32>
    %cst = arith.constant dense<0.000000e+00> : vector<4x32xf32>
    %2 = tpu.matmul %0, %1, %cst {dimension_numbers = #tpu.dot_dimension_numbers<[1], [0], [0], [1], [0, 0, 1, 1], [], []>} : vector<4x16xf32>, vector<16x32xf32>, vector<4x32xf32> -> vector<4x32xf32>
    %c0_3 = arith.constant 0 : index
    %c0_4 = arith.constant 0 : index
    %3 = vector.load %arg3[%c0_3, %c0_4] : memref<1x32xf32, #tpu.memory_space<vmem>>, vector<1x32xf32>
    %4 = vector.broadcast %3 : vector<1x32xf32> to vector<4x32xf32>
    %5 = arith.addf %2, %4 : vector<4x32xf32>
    %cst_5 = arith.constant 0.000000e+00 : f32
    %6 = vector.broadcast %cst_5 : f32 to vector<4x32xf32>
    %7 = arith.maximumf %5, %6 : vector<4x32xf32>
    %c0_6 = arith.constant 0 : index
    %c0_7 = arith.constant 0 : index
    %8 = vector.load %arg4[%c0_6, %c0_7] : memref<32x16xf32, #tpu.memory_space<vmem>>, vector<32x16xf32>
    %cst_8 = arith.constant dense<0.000000e+00> : vector<4x16xf32>
    %9 = tpu.matmul %7, %8, %cst_8 {dimension_numbers = #tpu.dot_dimension_numbers<[1], [0], [0], [1], [0, 0, 1, 1], [], []>} : vector<4x32xf32>, vector<32x16xf32>, vector<4x16xf32> -> vector<4x16xf32>
    %c0_9 = arith.constant 0 : index
    %c0_10 = arith.constant 0 : index
    %10 = vector.load %arg5[%c0_9, %c0_10] : memref<1x16xf32, #tpu.memory_space<vmem>>, vector<1x16xf32>
    %11 = vector.broadcast %10 : vector<1x16xf32> to vector<4x16xf32>
    %12 = arith.addf %9, %11 : vector<4x16xf32>
    %cst_11 = arith.constant 0.000000e+00 : f32
    %13 = vector.broadcast %cst_11 : f32 to vector<4x16xf32>
    %14 = arith.maximumf %12, %13 : vector<4x16xf32>
    %c0_12 = arith.constant 0 : index
    %c0_13 = arith.constant 0 : index
    %15 = vector.load %arg6[%c0_12, %c0_13] : memref<16x8xf32, #tpu.memory_space<vmem>>, vector<16x8xf32>
    %cst_14 = arith.constant dense<0.000000e+00> : vector<4x8xf32>
    %16 = tpu.matmul %14, %15, %cst_14 {dimension_numbers = #tpu.dot_dimension_numbers<[1], [0], [0], [1], [0, 0, 1, 1], [], []>} : vector<4x16xf32>, vector<16x8xf32>, vector<4x8xf32> -> vector<4x8xf32>
    %c0_15 = arith.constant 0 : index
    %c0_16 = arith.constant 0 : index
    %17 = vector.load %arg7[%c0_15, %c0_16] : memref<1x8xf32, #tpu.memory_space<vmem>>, vector<1x8xf32>
    %18 = vector.broadcast %17 : vector<1x8xf32> to vector<4x8xf32>
    %19 = arith.addf %16, %18 : vector<4x8xf32>
    %cst_17 = arith.constant 0.000000e+00 : f32
    %20 = vector.broadcast %cst_17 : f32 to vector<4x8xf32>
    %21 = arith.maximumf %19, %20 : vector<4x8xf32>
    %c0_18 = arith.constant 0 : index
    %c0_19 = arith.constant 0 : index
    %22 = vector.load %arg8[%c0_18, %c0_19] : memref<8x8xf32, #tpu.memory_space<vmem>>, vector<8x8xf32>
    %cst_20 = arith.constant dense<0.000000e+00> : vector<4x8xf32>
    %23 = tpu.matmul %21, %22, %cst_20 {dimension_numbers = #tpu.dot_dimension_numbers<[1], [0], [0], [1], [0, 0, 1, 1], [], []>} : vector<4x8xf32>, vector<8x8xf32>, vector<4x8xf32> -> vector<4x8xf32>
    %c0_21 = arith.constant 0 : index
    %c0_22 = arith.constant 0 : index
    %24 = vector.load %arg9[%c0_21, %c0_22] : memref<1x8xf32, #tpu.memory_space<vmem>>, vector<1x8xf32>
    %25 = vector.broadcast %24 : vector<1x8xf32> to vector<4x8xf32>
    %26 = arith.addf %23, %25 : vector<4x8xf32>
    %c0_23 = arith.constant 0 : index
    %c0_24 = arith.constant 0 : index
    %27 = vector.load %arg10[%c0_23, %c0_24] : memref<4x8xf32, #tpu.memory_space<vmem>>, vector<4x8xf32>
    tpu.vector_store %arg10[%c0_23, %c0_24], %26 {strides = array<i32>} : memref<4x8xf32, #tpu.memory_space<vmem>>, vector<4x8xf32>,
    return
  }
  func.func @transform_0(%arg0: i32) -> (i32, i32) {
    %c0_i32 = arith.constant 0 : i32
    %c0_i32_0 = arith.constant 0 : i32
    return %arg0, %c0_i32 : i32, i32
  }
  func.func @transform_1(%arg0: i32) -> (i32, i32) {
    %c0_i32 = arith.constant 0 : i32
    %c0_i32_0 = arith.constant 0 : i32
    %c0_i32_1 = arith.constant 0 : i32
    return %c0_i32, %c0_i32_0 : i32, i32
  }
  func.func @transform_2(%arg0: i32) -> (i32, i32) {
    %c0_i32 = arith.constant 0 : i32
    %c0_i32_0 = arith.constant 0 : i32
    %c0_i32_1 = arith.constant 0 : i32
    return %c0_i32, %c0_i32_0 : i32, i32
  }
  func.func @transform_3(%arg0: i32) -> (i32, i32) {
    %c0_i32 = arith.constant 0 : i32
    %c0_i32_0 = arith.constant 0 : i32
    %c0_i32_1 = arith.constant 0 : i32
    return %c0_i32, %c0_i32_0 : i32, i32
  }
  func.func @transform_4(%arg0: i32) -> (i32, i32) {
    %c0_i32 = arith.constant 0 : i32
    %c0_i32_0 = arith.constant 0 : i32
    %c0_i32_1 = arith.constant 0 : i32
    return %c0_i32, %c0_i32_0 : i32, i32
  }
  func.func @transform_5(%arg0: i32) -> (i32, i32) {
    %c0_i32 = arith.constant 0 : i32
    %c0_i32_0 = arith.constant 0 : i32
    %c0_i32_1 = arith.constant 0 : i32
    return %c0_i32, %c0_i32_0 : i32, i32
  }
  func.func @transform_6(%arg0: i32) -> (i32, i32) {
    %c0_i32 = arith.constant 0 : i32
    %c0_i32_0 = arith.constant 0 : i32
    %c0_i32_1 = arith.constant 0 : i32
    return %c0_i32, %c0_i32_0 : i32, i32
  }
  func.func @transform_7(%arg0: i32) -> (i32, i32) {
    %c0_i32 = arith.constant 0 : i32
    %c0_i32_0 = arith.constant 0 : i32
    %c0_i32_1 = arith.constant 0 : i32
    return %c0_i32, %c0_i32_0 : i32, i32
  }
  func.func @transform_8(%arg0: i32) -> (i32, i32) {
    %c0_i32 = arith.constant 0 : i32
    %c0_i32_0 = arith.constant 0 : i32
    %c0_i32_1 = arith.constant 0 : i32
    return %c0_i32, %c0_i32_0 : i32, i32
  }
  func.func @transform_9(%arg0: i32) -> (i32, i32) {
    %c0_i32 = arith.constant 0 : i32
    %c0_i32_0 = arith.constant 0 : i32
    return %arg0, %c0_i32 : i32, i32
  }
}

</mosaic_0001>

<bundles_post_ra>
// kernel: dqn_forward.1
= control target key start
LH: loop header
LB: loop body
LE: loop exit
PB: predicated region body
PF: predicated region fallthrough
CT: control target
= control target key end

     0   :  { %v461_v1 = vmov 0.0   ;;  %vm462_vm0 = vmmov 0   ;;  %s565_s0 = inlined_call_operand.vmem [shape: f32[4,16], index: 0, kind: input, shape index: {}]   ;;  %s566_s1 = inlined_call_operand.vmem [shape: f32[16,32], index: 1, kind: input, shape index: {}]   ;;  %s567_s2 = inlined_call_operand.vmem [shape: f32[1,32], index: 2, kind: input, shape index: {}]   ;;  %s568_s3 = inlined_call_operand.vmem [shape: f32[32,16], index: 3, kind: input, shape index: {}]   ;;  %s569_s4 = inlined_call_operand.vmem [shape: f32[1,16], index: 4, kind: input, shape index: {}]   ;;  %s570_s5 = inlined_call_operand.vmem [shape: f32[16,8], index: 5, kind: input, shape index: {}]   ;;  %s571_s6 = inlined_call_operand.vmem [shape: f32[1,8], index: 6, kind: input, shape index: {}]   ;;  %s572_s7 = inlined_call_operand.vmem [shape: f32[8,8], index: 7, kind: input, shape index: {}]   ;;  %s573_s8 = inlined_call_operand.vmem [shape: f32[1,8], index: 8, kind: input, shape index: {}]   ;;  %s574_s9 = inlined_call_operand.hbm [shape: f32[4,8], index: 9, kind: output, shape index: {}]  }
   0x1   :  { %v35_v0 = vld [vmem:[%s566_s1 + $0x8] sm:$0xff]  ;;  %406 = vmatprep.subr.mxu0 %v461_v1  ;;  %v34_v2 = vld [vmem:[%s566_s1] sm:$0xff]  ;;  %410 = vmatprep.mubr.msk.f32.mxu0 %vm462_vm0, %v461_v1  ;;  %v121_v3 = vld [vmem:[%s568_s3 + $0x18] sm:$0xff] }
   0x2   :  { %14 = vsyncpa [#allocation3], 0  ;;  %407 = vmatpush3.msra.mxu0 %v35_v0  ;;  %v33_v4 = vld [vmem:[%s565_s0] sm:$0xf]  ;;  %vm43_vm1 = vcmask 130048   ;;  %413 = vmatprep.subr.mxu1 %v461_v1  ;;  %v120_v5 = vld [vmem:[%s568_s3 + $0x10] sm:$0xff] }
   0x3   :  { %408 = vmatprep.subr.mxu0 %v461_v1  ;;  %414 = vmatpush3.msra.mxu1 %v121_v3  ;;  %v119_v6 = vld [vmem:[%s568_s3 + $0x8] sm:$0xff]  ;;  %v118_v7 = vld [vmem:[%s568_s3] sm:$0xff]  ;;  %vm129_vm2 = vcmask 261120   ;;  %vm295_vm3 = vcmask 64512   ;;  %s463_s10 = smov [#allocation2]   ;;  %vm369_vm4 = vcmask 60416  }
   0x4   :  { %409 = vmatpush3.msra.mxu0 %v34_v2  ;;  %415 = vmatprep.subr.mxu1 %v461_v1  ;;  %v385_v8 = vld [vmem:[%s567_s2] ss:$0 sm:$0xff]  ;;  %v205_v13 = vld [vmem:[%s570_s5 + $0x8] sm:$0xff]  ;;  %s377_s11 = sshll.u32 %s463_s10, 4  ;;  %s378_s11 = int_to_ptr.vmem [resolvable:$true] %s377_s11 }
   0x5   :  { %411 = vmatmul.mubr.msk.f32.vlgmr.msra.gmra.mxu0 %vm43_vm1, %v33_v4  ;;  %421 = vmatprep.mubr.msk.f32.mxu1 %vm462_vm0, %v461_v1  ;;  %v204_v14 = vld [vmem:[%s570_s5] sm:$0xff]  ;;  %p444_p1 = scmp.lt.s32.totalorder %s378_s11, %s378_s11 }
   0x6   :  { %424 = vmatprep.subr.mxu0 %v461_v1  ;;  %428 = vmatprep.mubr.msk.f32.mxu0 %vm462_vm0, %v461_v1  ;;  %v387_v15 = vld [vmem:[%s569_s4] ss:$0 sm:$0xff] }
   0x7   :  { %416 = vmatpush3.msra.mxu1 %v120_v5  ;;  %425 = vmatpush3.msra.mxu0 %v205_v13  ;;  %v287_v20 = vld [vmem:[%s572_s7] sm:$0xff]  ;;  %s439_s7 = scalar_lea.vmem %s378_s11, 64 }
   0x8   :  { %417 = vmatprep.subr.mxu1 %v461_v1  ;;  %426 = vmatprep.subr.mxu0 %v461_v1  ;;  %v389_v21 = vld [vmem:[%s571_s6] ss:$0 sm:$0xff]  ;;  %p440_p0 = scmp.ne.s32.totalorder %s378_s11, %s439_s7  ;;  %p445_p2 = scmp.lt.s32.totalorder %s439_s7, %s439_s7 }
   0x9   :  { %418 = vmatpush3.msra.mxu1 %v119_v6  ;;  %427 = vmatpush3.msra.mxu0 %v204_v14  ;;  %v391_v26 = vld [vmem:[%s573_s8] ss:$0 sm:$0xff] }
   0xa   :  { %419 = vmatprep.subr.mxu1 %v461_v1  ;;  %431 = vmatprep.subr.mxu0 %v461_v1  ;;  %p446_p3 = por %p445_p2, %p444_p1 }
   0xb   :  { %420 = vmatpush3.msra.mxu1 %v118_v7 }
   0xc   :  { %p447_p4 = pnand %p446_p3, %p440_p0 }
  0xc5   :  { %v113_v9 = vpop.f32.mrf.mxu0 }
  0xc6   :  { %v114_v10 = vadd.f32 %v385_v8, %v113_v9 }
  0xc7   :  { %v412_v11 = vpop.f32.mrf.mxu0 }
  0xc8   :  { %v117_v12 = vmax.f32 %v114_v10, 0.0 }
  0xca   :  { %422 = vmatmul.mubr.msk.f32.vlgmr.msra.gmra.mxu1 %vm129_vm2, %v117_v12 }
 0x18a   :  { %v199_v16 = vpop.f32.mrf.mxu1 }
 0x18b   :  { %v200_v17 = vadd.f32 %v387_v15, %v199_v16 }
 0x18c   :  { %v423_v18 = vpop.f32.mrf.mxu1 }
 0x18d   :  { %v203_v19 = vmax.f32 %v200_v17, 0.0 }
 0x18f   :  { %429 = vmatmul.mubr.msk.f32.vlgmr.msra.gmra.mxu0 %vm43_vm1, %v203_v19 }
 0x190   :  { %433 = vmatprep.mubr.msk.f32.mxu0 %vm462_vm0, %v461_v1  ;;  %432 = vmatpush3.msra.mxu0 %v287_v20 }
 0x24f   :  { %v282_v22 = vpop.f32.mrf.mxu0 }
 0x250   :  { %v283_v23 = vadd.f32 %v389_v21, %v282_v22 }
 0x251   :  { %v430_v24 = vpop.f32.mrf.mxu0 }
 0x252   :  { %v286_v25 = vmax.f32 %v283_v23, 0.0 }
 0x254   :  { %434 = vmatmul.mubr.msk.f32.vlgmr.msra.gmra.mxu0 %vm295_vm3, %v286_v25 }
 0x314   :  { %v365_v27 = vpop.f32.mrf.mxu0 }
 0x315   :  { %v366_v28 = vadd.f32 %v391_v26, %v365_v27 }
 0x316   :  { %v435_v29 = vpop.f32.mrf.mxu0 }
 0x317   :  { %370 = vst.msk [vmem:[#allocation2] sm:$0xf] %vm369_vm4, %v366_v28 }
 0x318   :  { %450 = shalt.err (!%p447_p4)
}
 0x319   :  { %380 = dma.vmem_to_hbm [thread:$0]  %s378_s11, 64, %s574_s9, [#allocation3]  }
 0x31a   :  { %459 = dma.done.wait [#allocation3], 64  }
 0x31b   :  { %460 = vsyncadd [#allocation3], 4294967232 }
 0x31c   :  { %384 = vsyncpa [#allocation3], 1 }

</bundles_post_ra>
